<compile_context>
chip_gen: v7x
topology: tpu7x:2x2x1
jax: 0.10.0
libtpu: 0.0.40
codegen_flags: <defaults>
</compile_context>

<pallas_src>
import jax
import jax.numpy as jnp
from jax.experimental import pallas as pl
from jax.experimental.pallas import tpu as pltpu

# Below this many bytes per gathered row, a Pallas launch + per-row DMAs is latency
# dominated; fall back to a vmapped lax.dynamic_slice in plain XLA instead.
_PALLAS_MIN_ROW_BYTES = 4096
# Rolling DMA semaphore pool depth (max copies in flight per grid step).
_MAX_DMA_IN_FLIGHT = 16


def _make_gather_kernel(B, Bb, Bpad, T, segment_length, sem_depth):
    tail = Bpad - B  # number of padded (invalid) rows appended to the final grid step

    def kernel(seq_starts_ref, enc_hbm, out_hbm, sems):
        i = pl.program_id(0)

        # --- Phase 0: all scalar reads + clamps BEFORE any DMA wait.
        starts = []
        for r in range(Bb):
            s = seq_starts_ref[i * Bb + r]
            # Clamp so seq_start + segment_length never runs past T (OOB-safe; matches
            # lax.dynamic_slice clamping semantics).
            starts.append(jnp.minimum(jnp.maximum(s, 0), T - segment_length))

        # --- Build all copy descriptors (pure Python bookkeeping; no DMA issued yet).
        #     Each row is ONE contiguous HBM->HBM copy of segment_length*H elements.
        copies = []
        for r in range(Bb):
            b = i * Bb + r
            copies.append(
                pltpu.make_async_copy(
                    enc_hbm.at[b, pl.ds(starts[r], segment_length), :],
                    out_hbm.at[b],
                    sems.at[r % sem_depth],
                )
            )

        def run(r, fn):
            # Only the statically-known trailing rows of the padded last step can be
            # invalid; everything else runs unguarded.
            if tail and r >= Bb - tail:
                @pl.when(i * Bb + r < B)
                def _():
                    fn()
            else:
                fn()

        # --- Phase 1: issue all copies, waiting in rolling fashion so up to `sem_depth`
        #     copies are always in flight.
        for r in range(Bb):
            if r >= sem_depth:
                run(r - sem_depth, copies[r - sem_depth].wait)
            run(r, copies[r].start)

        # --- Phase 2: drain the still-outstanding copies.
        for r in range(max(0, Bb - sem_depth), Bb):
            run(r, copies[r].wait)

    return kernel


def _pallas_gather(encoder_output, seq_starts, segment_length, num_grid_steps):
    """Gather encoder_output[b, s_b : s_b + segment_length, :] for every batch row b."""
    B, T, H = encoder_output.shape

    # <=2 grid steps: 1 is enough on v5e/v6e (1 TC); 2 lets v7x's two TensorCores both
    # issue gather DMAs.  Rows within a step are handled by a static unroll in the kernel.
    num_steps = max(1, min(num_grid_steps, B))
    Bb = -(-B // num_steps)            # rows per grid step (ceil)
    num_steps = -(-B // Bb)
    Bpad = num_steps * Bb
    if Bpad > B:                       # keep SMEM reads of seq_starts in-bounds
        seq_starts = jnp.pad(seq_starts, (0, Bpad - B))
    sem_depth = min(Bb, _MAX_DMA_IN_FLIGHT)

    itemsize = jnp.dtype(encoder_output.dtype).itemsize
    bytes_moved = 2 * B * segment_length * H * itemsize   # read windows + write output

    return pl.pallas_call(
        _make_gather_kernel(B, Bb, Bpad, T, segment_length, sem_depth),
        out_shape=jax.ShapeDtypeStruct((B, segment_length, H), encoder_output.dtype),
        grid_spec=pltpu.PrefetchScalarGridSpec(
            num_scalar_prefetch=1,
            grid=(num_steps,),
            in_specs=[pl.BlockSpec(memory_space=pl.ANY)],   # encoder stays in HBM
            out_specs=pl.BlockSpec(memory_space=pl.ANY),    # direct HBM->HBM, no VMEM bounce
            scratch_shapes=[pltpu.SemaphoreType.DMA((sem_depth,))],
        ),
        compiler_params=pltpu.CompilerParams(
            dimension_semantics=("parallel",)),
        cost_estimate=pl.CostEstimate(flops=0, transcendentals=0,
                                      bytes_accessed=bytes_moved),
    )(seq_starts, encoder_output)


def sampling_window_forward(encoder_output, audio, seq_starts,
                            upsampling_rate, segment_length_up,
                            use_pallas=None, num_grid_steps=2):
    """Pallas implementation of SamplingWindow.forward -> (encoder_segment, audio_segment)."""
    segment_length = segment_length_up // upsampling_rate
    B, T, H = encoder_output.shape
    S = audio.shape[1]

    # --- audio segment: static pad (or trim, matching F.pad's negative-pad behavior) to
    #     segment_length_up.  No data-dependent indexing -> plain XLA pad/memcpy.
    #     NOTE: like the reference PyTorch module, the audio window is NOT offset by
    #     seq_start * upsampling_rate.
    if S >= segment_length_up:
        audio_segment = audio[:, :segment_length_up]
    else:
        audio_segment = jnp.pad(audio, ((0, 0), (0, segment_length_up - S)))

    # --- encoder segment ---
    if T > segment_length:
        if seq_starts is None:
            # PyTorch would raise here; default to windows starting at t=0.
            seq_starts = jnp.zeros((B,), jnp.int32)
        seq_starts = seq_starts.astype(jnp.int32)

        row_bytes = segment_length * H * jnp.dtype(encoder_output.dtype).itemsize
        if use_pallas is None:
            # Sub-few-KiB rows are DMA-latency dominated; let XLA's fused gather handle them.
            use_pallas = row_bytes >= _PALLAS_MIN_ROW_BYTES

        if use_pallas:
            encoder_segment = _pallas_gather(encoder_output, seq_starts,
                                             segment_length, num_grid_steps)
        else:
            encoder_segment = jax.vmap(
                lambda row, s: jax.lax.dynamic_slice(row, (s, 0), (segment_length, H))
            )(encoder_output, seq_starts)
    else:
        # Static zero-pad along time (no data-dependent indexing) -> plain XLA.
        encoder_segment = jnp.pad(
            encoder_output, ((0, 0), (0, segment_length - T), (0, 0)))

    return encoder_segment, audio_segment


def _reference(encoder_output, audio, seq_starts, upsampling_rate, segment_length_up):
    """Pure-JAX reference reproducing the PyTorch semantics."""
    segment_length = segment_length_up // upsampling_rate
    B, T, H = encoder_output.shape
    if T > segment_length:
        if seq_starts is None:
            seq_starts = jnp.zeros((B,), jnp.int32)
        enc = jnp.stack([
            jax.lax.dynamic_slice(encoder_output[i], (seq_starts[i], 0),
                                  (segment_length, H))
            for i in range(B)
        ])
    else:
        enc = jnp.pad(encoder_output, ((0, 0), (0, segment_length - T), (0, 0)))
    S = audio.shape[1]
    if S >= segment_length_up:
        aud = audio[:, :segment_length_up]
    else:
        aud = jnp.pad(audio, ((0, 0), (0, segment_length_up - S)))
    return enc, aud


if __name__ == "__main__":
    # Deterministic "config" (mirrors model_config / train_config of __init__).
    upsampling_rate = 8
    segment_length_up = 64                                   # window segment_length
    segment_length = segment_length_up // upsampling_rate    # = 8

    key = jax.random.PRNGKey(0)
    k1, k2, k3 = jax.random.split(key, 3)

    # --- Main config: Pallas HBM->HBM gather path.  B=3 does not split evenly across the
    #     2 grid steps, so the guarded trailing-row path is exercised too.
    B, T, H = 3, 16, 128      # T > segment_length -> gather branch; 8*128*4 B = 4 KiB/row
    S = 48                    # audio samples < segment_length_up -> zero pad

    encoder_output = jax.random.normal(k1, (B, T, H), dtype=jnp.float32)
    audio = jax.random.normal(k2, (B, S), dtype=jnp.float32)
    seq_starts = jnp.array([2, 5, 7], dtype=jnp.int32)   # valid: start + 8 <= 16

    enc_seg, aud_seg = sampling_window_forward(
        encoder_output, audio, seq_starts, upsampling_rate, segment_length_up,
        use_pallas=True)
    jax.block_until_ready((enc_seg, aud_seg))

    enc_ref, aud_ref = _reference(
        encoder_output, audio, seq_starts, upsampling_rate, segment_length_up)
    assert enc_seg.shape == (B, segment_length, H)
    assert aud_seg.shape == (B, segment_length_up)
    assert jnp.allclose(enc_seg, enc_ref)
    assert jnp.allclose(aud_seg, aud_ref)

    # --- Tiny-row config: auto-dispatch falls back to the plain-XLA gather (rows < 4 KiB).
    H2 = 32
    enc_small_rows = jax.random.normal(k3, (B, T, H2), dtype=jnp.float32)
    enc_seg2, aud_seg2 = sampling_window_forward(
        enc_small_rows, audio, seq_starts, upsampling_rate, segment_length_up)
    jax.block_until_ready((enc_seg2, aud_seg2))
    enc_ref2, aud_ref2 = _reference(
        enc_small_rows, audio, seq_starts, upsampling_rate, segment_length_up)
    assert jnp.allclose(enc_seg2, enc_ref2)
    assert jnp.allclose(aud_seg2, aud_ref2)

    # --- "No gather" branch (T <= segment_length -> static zero-pad).
    enc_short = jax.random.normal(k1, (B, segment_length - 3, H2), dtype=jnp.float32)
    enc_seg3, aud_seg3 = sampling_window_forward(
        enc_short, audio, None, upsampling_rate, segment_length_up)
    jax.block_until_ready((enc_seg3, aud_seg3))
    enc_ref3, aud_ref3 = _reference(
        enc_short, audio, None, upsampling_rate, segment_length_up)
    assert jnp.allclose(enc_seg3, enc_ref3)
    assert jnp.allclose(aud_seg3, aud_ref3)

    print("KERNEL_OK")
</pallas_src>

<mosaic_0001>
module attributes {stable_mosaic.version = 11 : i64} {
  func.func @kernel(%arg0: i32, %arg1: memref<4xi32, #tpu.memory_space<smem>>, %arg2: memref<3x16x128xf32, #tpu.memory_space<any>>, %arg3: memref<3x8x128xf32, #tpu.memory_space<any>>, %arg4: memref<2x!tpu.dma_semaphore, #tpu.memory_space<semaphore_mem>>) attributes {dimension_semantics = [#tpu.dimension_semantics<parallel>], iteration_bounds = array<i64: 2>, scalar_prefetch = 1 : i64, scratch_operands = 1 : i64, tpu.core_type = #tpu.core_type<tc>, window_params = [{}, {}]} {
    %c2_i32 = arith.constant 2 : i32
    %0 = arith.muli %arg0, %c2_i32 : i32
    %c0_i32 = arith.constant 0 : i32
    %1 = arith.addi %0, %c0_i32 : i32
    %2 = arith.index_cast %1 : i32 to index
    %3 = memref.load %arg1[%2] : memref<4xi32, #tpu.memory_space<smem>>
    %c0_i32_0 = arith.constant 0 : i32
    %4 = arith.maxsi %3, %c0_i32_0 : i32
    %c8_i32 = arith.constant 8 : i32
    %5 = arith.minsi %4, %c8_i32 : i32
    %c2_i32_1 = arith.constant 2 : i32
    %6 = arith.muli %arg0, %c2_i32_1 : i32
    %c1_i32 = arith.constant 1 : i32
    %7 = arith.addi %6, %c1_i32 : i32
    %8 = arith.index_cast %7 : i32 to index
    %9 = memref.load %arg1[%8] : memref<4xi32, #tpu.memory_space<smem>>
    %c0_i32_2 = arith.constant 0 : i32
    %10 = arith.maxsi %9, %c0_i32_2 : i32
    %c8_i32_3 = arith.constant 8 : i32
    %11 = arith.minsi %10, %c8_i32_3 : i32
    %c2_i32_4 = arith.constant 2 : i32
    %12 = arith.muli %arg0, %c2_i32_4 : i32
    %c0_i32_5 = arith.constant 0 : i32
    %13 = arith.addi %12, %c0_i32_5 : i32
    %c2_i32_6 = arith.constant 2 : i32
    %14 = arith.muli %arg0, %c2_i32_6 : i32
    %c1_i32_7 = arith.constant 1 : i32
    %15 = arith.addi %14, %c1_i32_7 : i32
    %c0_i32_8 = arith.constant 0 : i32
    %c0_i32_9 = arith.constant 0 : i32
    %16 = tpu.memref_slice %arg2[%13, %5, %c0_i32_9] : memref<3x16x128xf32, #tpu.memory_space<any>> -> memref<1x8x128xf32, #tpu.memory_space<any>>
    %17 = tpu.memref_squeeze %16 : memref<1x8x128xf32, #tpu.memory_space<any>> -> memref<8x128xf32, #tpu.memory_space<any>>
    %c0_i32_10 = arith.constant 0 : i32
    %c0_i32_11 = arith.constant 0 : i32
    %18 = tpu.memref_slice %arg3[%13, %c0_i32_10, %c0_i32_11] : memref<3x8x128xf32, #tpu.memory_space<any>> -> memref<1x8x128xf32, #tpu.memory_space<any>>
    %19 = tpu.memref_squeeze %18 : memref<1x8x128xf32, #tpu.memory_space<any>> -> memref<8x128xf32, #tpu.memory_space<any>>
    %20 = tpu.memref_slice %arg4[%c0_i32_8] : memref<2x!tpu.dma_semaphore, #tpu.memory_space<semaphore_mem>> -> memref<1x!tpu.dma_semaphore, #tpu.memory_space<semaphore_mem>>
    %21 = tpu.memref_squeeze %20 : memref<1x!tpu.dma_semaphore, #tpu.memory_space<semaphore_mem>> -> memref<!tpu.dma_semaphore, #tpu.memory_space<semaphore_mem>>
    tpu.enqueue_dma source(%17 : memref<8x128xf32, #tpu.memory_space<any>>) target(%19 : memref<8x128xf32, #tpu.memory_space<any>>) target_semaphore(%21 : memref<!tpu.dma_semaphore, #tpu.memory_space<semaphore_mem>>)
    %c2_i32_12 = arith.constant 2 : i32
    %22 = arith.muli %arg0, %c2_i32_12 : i32
    %c1_i32_13 = arith.constant 1 : i32
    %23 = arith.addi %22, %c1_i32_13 : i32
    %c3_i32 = arith.constant 3 : i32
    %24 = arith.cmpi slt, %23, %c3_i32 : i32
    %25 = arith.extui %24 : i1 to i32
    %c1_i32_14 = arith.constant 1 : i32
    %c0_i32_15 = arith.constant 0 : i32
    %26 = arith.cmpi ne, %25, %c0_i32_15 : i32
    scf.if %26 {
      %c0_i32_25 = arith.constant 0 : i32
      %38 = tpu.memref_slice %arg2[%15, %11, %c0_i32_25] : memref<3x16x128xf32, #tpu.memory_space<any>> -> memref<1x8x128xf32, #tpu.memory_space<any>>
      %39 = tpu.memref_squeeze %38 : memref<1x8x128xf32, #tpu.memory_space<any>> -> memref<8x128xf32, #tpu.memory_space<any>>
      %c0_i32_26 = arith.constant 0 : i32
      %c0_i32_27 = arith.constant 0 : i32
      %40 = tpu.memref_slice %arg3[%15, %c0_i32_26, %c0_i32_27] : memref<3x8x128xf32, #tpu.memory_space<any>> -> memref<1x8x128xf32, #tpu.memory_space<any>>
      %41 = tpu.memref_squeeze %40 : memref<1x8x128xf32, #tpu.memory_space<any>> -> memref<8x128xf32, #tpu.memory_space<any>>
      %42 = tpu.memref_slice %arg4[%c1_i32_14] : memref<2x!tpu.dma_semaphore, #tpu.memory_space<semaphore_mem>> -> memref<1x!tpu.dma_semaphore, #tpu.memory_space<semaphore_mem>>
      %43 = tpu.memref_squeeze %42 : memref<1x!tpu.dma_semaphore, #tpu.memory_space<semaphore_mem>> -> memref<!tpu.dma_semaphore, #tpu.memory_space<semaphore_mem>>
      tpu.enqueue_dma source(%39 : memref<8x128xf32, #tpu.memory_space<any>>) target(%41 : memref<8x128xf32, #tpu.memory_space<any>>) target_semaphore(%43 : memref<!tpu.dma_semaphore, #tpu.memory_space<semaphore_mem>>)
    } else {
    }
    %c0_i32_16 = arith.constant 0 : i32
    %c0_i32_17 = arith.constant 0 : i32
    %27 = tpu.memref_slice %arg2[%13, %5, %c0_i32_17] : memref<3x16x128xf32, #tpu.memory_space<any>> -> memref<1x8x128xf32, #tpu.memory_space<any>>
    %28 = tpu.memref_squeeze %27 : memref<1x8x128xf32, #tpu.memory_space<any>> -> memref<8x128xf32, #tpu.memory_space<any>>
    %c0_i32_18 = arith.constant 0 : i32
    %c0_i32_19 = arith.constant 0 : i32
    %29 = tpu.memref_slice %arg3[%13, %c0_i32_18, %c0_i32_19] : memref<3x8x128xf32, #tpu.memory_space<any>> -> memref<1x8x128xf32, #tpu.memory_space<any>>
    %30 = tpu.memref_squeeze %29 : memref<1x8x128xf32, #tpu.memory_space<any>> -> memref<8x128xf32, #tpu.memory_space<any>>
    %31 = tpu.memref_slice %arg4[%c0_i32_16] : memref<2x!tpu.dma_semaphore, #tpu.memory_space<semaphore_mem>> -> memref<1x!tpu.dma_semaphore, #tpu.memory_space<semaphore_mem>>
    %32 = tpu.memref_squeeze %31 : memref<1x!tpu.dma_semaphore, #tpu.memory_space<semaphore_mem>> -> memref<!tpu.dma_semaphore, #tpu.memory_space<semaphore_mem>>
    tpu.wait_dma2 semaphore(%32 : memref<!tpu.dma_semaphore, #tpu.memory_space<semaphore_mem>>) src(%28 : memref<8x128xf32, #tpu.memory_space<any>>) dst(%30 : memref<8x128xf32, #tpu.memory_space<any>>)
    %c2_i32_20 = arith.constant 2 : i32
    %33 = arith.muli %arg0, %c2_i32_20 : i32
    %c1_i32_21 = arith.constant 1 : i32
    %34 = arith.addi %33, %c1_i32_21 : i32
    %c3_i32_22 = arith.constant 3 : i32
    %35 = arith.cmpi slt, %34, %c3_i32_22 : i32
    %36 = arith.extui %35 : i1 to i32
    %c1_i32_23 = arith.constant 1 : i32
    %c0_i32_24 = arith.constant 0 : i32
    %37 = arith.cmpi ne, %36, %c0_i32_24 : i32
    scf.if %37 {
      %c0_i32_25 = arith.constant 0 : i32
      %38 = tpu.memref_slice %arg2[%15, %11, %c0_i32_25] : memref<3x16x128xf32, #tpu.memory_space<any>> -> memref<1x8x128xf32, #tpu.memory_space<any>>
      %39 = tpu.memref_squeeze %38 : memref<1x8x128xf32, #tpu.memory_space<any>> -> memref<8x128xf32, #tpu.memory_space<any>>
      %c0_i32_26 = arith.constant 0 : i32
      %c0_i32_27 = arith.constant 0 : i32
      %40 = tpu.memref_slice %arg3[%15, %c0_i32_26, %c0_i32_27] : memref<3x8x128xf32, #tpu.memory_space<any>> -> memref<1x8x128xf32, #tpu.memory_space<any>>
      %41 = tpu.memref_squeeze %40 : memref<1x8x128xf32, #tpu.memory_space<any>> -> memref<8x128xf32, #tpu.memory_space<any>>
      %42 = tpu.memref_slice %arg4[%c1_i32_23] : memref<2x!tpu.dma_semaphore, #tpu.memory_space<semaphore_mem>> -> memref<1x!tpu.dma_semaphore, #tpu.memory_space<semaphore_mem>>
      %43 = tpu.memref_squeeze %42 : memref<1x!tpu.dma_semaphore, #tpu.memory_space<semaphore_mem>> -> memref<!tpu.dma_semaphore, #tpu.memory_space<semaphore_mem>>
      tpu.wait_dma2 semaphore(%43 : memref<!tpu.dma_semaphore, #tpu.memory_space<semaphore_mem>>) src(%39 : memref<8x128xf32, #tpu.memory_space<any>>) dst(%41 : memref<8x128xf32, #tpu.memory_space<any>>)
    } else {
    }
    return
  }
}

</mosaic_0001>

<bundles_post_ra>
// kernel: tpu_custom_call.1
= control target key start
LH: loop header
LB: loop body
LE: loop exit
PB: predicated region body
PF: predicated region fallthrough
CT: control target
= control target key end

     0   :  { %s264_s0 = inlined_call_operand.hbm [shape: s32[4], index: 0, kind: input, shape index: {}]   ;;  %s265_s1 = inlined_call_operand.hbm [shape: f32[3,16,128], index: 1, kind: input, shape index: {}]   ;;  %s266_s2 = inlined_call_operand.hbm [shape: f32[3,8,128], index: 2, kind: output, shape index: {}]  }
   0x1   :  { %s171_s11 = scalar_lea.hbm %s264_s0, 16 }
   0x2   :  { %p172_p0 = scmp.ne.s32.totalorder %s264_s0, %s171_s11  ;;  %p175_p1 = scmp.lt.u32.totalorder %s171_s11, %s264_s0 }
   0x4   :  { %p177_p2 = pnand %p175_p1, %p172_p0 }
   0x6   :  { %180 = shalt.err (!%p177_p2)  }
   0x7   :  { %s197_s16 = smov [#allocation4]  }
   0x8   :  { %8 = dma.hbm_to_smem %s264_s0, 16, %s197_s16, [#allocation3] }
   0x9   :  { %185 = dma.done.wait [#allocation3], 16 }
   0xa   :  { %186 = vsyncadd [#allocation3], 4294967280 }
   0xb   :  { %10 = sfence }
   0xc   :  { %s230_s19 = smov 0  }
   0xd LB: > { %s118_s20 = sshll.u32 %s195_s19, 1  ;;  %s148_s23 = sshll.u32 %s195_s19, 8  ;;  %s195_s19 = sphi %s230_s19, %s16_s19  }
   0xe   : > { %s19_s21 = sld [smem:[#allocation4 + %s118_s20]]  ;;  %s236_s22 = sadd.s32 1, %s118_s20 }
   0xf   : > { %s25_s0 = sld [smem:[#allocation4 + %s236_s22]]  ;;  %s243_s26 = scalar_lea.hbm %s266_s2, %s148_s23 }
  0x10   : > { %s146_s27 = sshll.u32 %s195_s19, 5  ;;  %p155_p3 = scmp.lt.s32.totalorder %s236_s22, 3 }
  0x11   : > { %s112_s28 = scalar_lea.hbm %s243_s26, 128  ;;  %s198_s8 = smov [#allocation2]  }
  0x12   : > { %s199_s9 = smov [#allocation5]   ;;  %s200_s10 = smov 0  }
  0x13   : > { %s201_s15 = smov [#allocation2 + $0x1]   ;;  %s202_s16 = smov [#allocation7]  }
  0x14   : > { %p20_p4 = scmp.gt.s32.totalorder %s19_s21, 0  ;;  %p119_p5 = scmp.lt.s32.totalorder %s19_s21, 8 }
  0x15   : > { %p26_p6 = scmp.gt.s32.totalorder %s25_s0, 0  ;;  %p124_p7 = scmp.lt.s32.totalorder %s25_s0, 8 }
  0x16   : > { %s268_s21 = smov (!%p20_p4, %s19_s21), 0 }
  0x17   : > { %s270_s0 = smov (!%p26_p6, %s25_s0), 0  ;;  %s272_s21 = smov (!%p119_p5, %s268_s21), 8 }
  0x18   : > { %s274_s0 = smov (!%p124_p7, %s270_s0), 8  ;;  %s31_s29 = sadd.s32 %s146_s27, %s272_s21 }
  0x19   : > { %s130_s30 = sshll.u32 %s31_s29, 4  ;;  %s105_s3 = sadd.s32 %s146_s27, %s274_s0 }
  0x1a   : > { %s33_s6 = scalar_lea.hbm %s265_s1, %s130_s30  ;;  %s136_s7 = sshll.u32 %s105_s3, 4 }
  0x1b   : > { %49 = dma.general %s33_s6, 128, %s243_s26, %s198_s8, %s199_s9, [#allocation6], %s200_s10, 0  }
  0x1c   : > { %s107_s13 = scalar_lea.hbm %s265_s1, %s136_s7 }
  0x1d   : > { %s108_s14 = scalar_lea.hbm %s107_s13, 256 }
  0x1e   : > { %152 = dma.general (%p155_p3), %s108_s14, 128, %s112_s28, %s201_s15, %s202_s16, [#allocation8], %s200_s10, 0  }
  0x1f   : > { %187 = dma.done.wait [#allocation2], 128 }
  0x20   : > { %188 = vsyncadd [#allocation2], 4294967168 }
  0x21   : > { %190 = dma.done.wait (%p155_p3), [#allocation2 + $0x1], 128 }
  0x22   : > { %192 = vsyncadd (%p155_p3), [#allocation2 + $0x1], 4294967168  ;;  %s16_s19 = sadd.s32 1, %s195_s19  }
  0x23   : > { %p13_p8 = scmp.ge.s32.totalorder %s16_s19, 2  }
  0x25   :  { %15 = sbr.rel (!%p13_p8) target bundleno = 13 (0xd), region = 34 }
  0x2c   :  { %84 = vsyncmov [#allocation2] }
  0x2f   :  { %s85_s17 = vpop.sfrf %84 }
  0x30   :  { %p140_p9 = scmp.ne.s32.totalorder %s85_s17, 0 }
  0x32   :  { %89 = shalt.err (%p140_p9)  }
  0x33   :  { %91 = vsyncmov [#allocation2 + $0x1] }
  0x36   :  { %s92_s18 = vpop.sfrf %91 }
  0x37   :  { %p141_p10 = scmp.ne.s32.totalorder %s92_s18, 0 }
  0x39   :  { %96 = shalt.err (%p141_p10)  }

</bundles_post_ra>
